<compile_context>
chip_gen: v7x
topology: tpu7x:2x2x1
jax: 0.10.0
libtpu: 0.0.40
codegen_flags: <defaults>
</compile_context>

<pallas_src>
import math

import jax
import jax.numpy as jnp
from jax.experimental import pallas as pl
from jax.experimental.pallas import tpu as pltpu

LANE = 128
SUBLANE = 8


def _round_up(n, m):
    return (n + m - 1) // m * m


def _sigmoid_approx(x):
    # 1 / (1 + exp(-x)): exp on the EUP, approximate reciprocal (vrcp) instead of
    # a VPU divide.
    return pl.reciprocal(1.0 + jnp.exp(-x), approx=True)


def make_decoder_kernel(n_hidden_blocks, compute_dtype):
    """Kernel over refs: (z, w0, b0, ..., w_out, b_out, recon)."""

    def kernel(*refs):
        z_ref = refs[0]
        out_ref = refs[-1]
        wb = refs[1:-1]

        h = z_ref[...].astype(jnp.float32)

        # MLP blocks: Linear -> ReLU  (batch_normalization=False, dropout=0.0)
        for li in range(n_hidden_blocks):
            w = wb[2 * li][...]
            b = wb[2 * li + 1][...]
            y = jnp.dot(h.astype(compute_dtype), w.astype(compute_dtype),
                        preferred_element_type=jnp.float32) + b
            h = jnp.maximum(y, 0.0)

        # Output layer: Linear -> Sigmoid
        w = wb[-2][...]
        b = wb[-1][...]
        logits = jnp.dot(h.astype(compute_dtype), w.astype(compute_dtype),
                         preferred_element_type=jnp.float32) + b
        out_ref[...] = _sigmoid_approx(logits)

    return kernel


def decoder_forward(z, params, *, block_b=512, compute_dtype=jnp.float32):
    """Decoder forward pass.

    z: (B, latent_dim) float array.
    params: list of (W, b) pairs in layer order (MLP blocks..., final linear),
            W stored transposed as (in, out), b as (1, out)  [y = x @ W + b].
    Returns: (B, output_size) reconstruction in float32.
    """
    B, latent = z.shape
    n_layers = len(params)
    n_hidden_blocks = n_layers - 1
    out_size = params[-1][0].shape[1]

    # ---- Lane-dense padding of all feature dims to multiples of 128.
    dims = [latent] + [w.shape[1] for (w, _) in params]
    dims_p = [_round_up(d, LANE) for d in dims]

    # ---- Batch tiling: block of up to `block_b` rows, multiple of 8 sublanes.
    bb = min(block_b, _round_up(B, SUBLANE))
    bb = _round_up(bb, SUBLANE)
    B_pad = _round_up(B, bb)
    grid = (B_pad // bb,)

    # ---- Pad input / weights / biases once in the wrapper (cheap XLA ops).
    z_p = jnp.zeros((B_pad, dims_p[0]), jnp.float32)
    z_p = z_p.at[:B, :latent].set(z.astype(jnp.float32))

    padded_params = []
    for li, (w, b) in enumerate(params):
        ip, op = dims_p[li], dims_p[li + 1]
        w_p = jnp.zeros((ip, op), jnp.float32).at[:w.shape[0], :w.shape[1]].set(
            w.astype(jnp.float32))
        b_p = jnp.zeros((1, op), jnp.float32).at[:, :b.shape[1]].set(
            b.astype(jnp.float32))
        padded_params += [w_p, b_p]

    # ---- BlockSpecs: batch-tiled activations, VMEM-resident weights/biases.
    in_specs = [pl.BlockSpec((bb, dims_p[0]), lambda i: (i, 0))]
    for li in range(n_layers):
        ip, op = dims_p[li], dims_p[li + 1]
        in_specs.append(pl.BlockSpec((ip, op), lambda i: (0, 0)))  # weight (resident)
        in_specs.append(pl.BlockSpec((1, op), lambda i: (0, 0)))   # bias   (resident)
    out_spec = pl.BlockSpec((bb, dims_p[-1]), lambda i: (i, 0))

    # ---- Cost estimate + VMEM budget sized to the chosen tiles.
    flops = 2 * B_pad * sum(dims_p[i] * dims_p[i + 1] for i in range(n_layers))
    weight_bytes = 4 * sum(dims_p[i] * dims_p[i + 1] + dims_p[i + 1]
                           for i in range(n_layers))
    bytes_accessed = 4 * B_pad * (dims_p[0] + dims_p[-1]) + weight_bytes
    transcendentals = B_pad * dims_p[-1]

    act_p = max(dims_p)
    vmem_bytes = (2 * 4 * bb * (dims_p[0] + dims_p[-1])  # double-buffered in/out tiles
                  + 2 * weight_bytes                     # resident params (dbl-buf alloc)
                  + 2 * 4 * bb * act_p                   # live intermediate activations
                  + (8 << 20))                           # headroom
    vmem_bytes = min(vmem_bytes, 48 << 20)               # stay well inside v7x 64 MiB/TC

    f = pl.pallas_call(
        make_decoder_kernel(n_hidden_blocks, compute_dtype),
        grid=grid,
        in_specs=in_specs,
        out_specs=out_spec,
        out_shape=jax.ShapeDtypeStruct((B_pad, dims_p[-1]), jnp.float32),
        compiler_params=pltpu.CompilerParams(
            dimension_semantics=("parallel",),
            vmem_limit_bytes=vmem_bytes),
        cost_estimate=pl.CostEstimate(flops=flops,
                                      transcendentals=transcendentals,
                                      bytes_accessed=bytes_accessed),
    )
    out_p = f(z_p, *padded_params)
    return out_p[:B, :out_size]


def make_linear_params(key, in_dim, out_dim):
    """Xavier-uniform weight (stored transposed (in, out)); PyTorch-default bias."""
    kw, kb = jax.random.split(key)
    limit = math.sqrt(6.0 / (in_dim + out_dim))
    w = jax.random.uniform(kw, (in_dim, out_dim), jnp.float32, -limit, limit)
    b_bound = 1.0 / math.sqrt(in_dim)
    b = jax.random.uniform(kb, (1, out_dim), jnp.float32, -b_bound, b_bound)
    return w, b


if __name__ == "__main__":
    # Small shapes consistent with the module: Decoder(latent=8, hidden=[16, 32], out=16).
    latent_dim = 8
    hidden_sizes = [16, 32]
    output_size = 16
    batch = 4

    key = jax.random.PRNGKey(0)
    keys = jax.random.split(key, len(hidden_sizes) + 2)

    # Layers: MLP 8->16 (Linear+ReLU), 16->32 (Linear+ReLU); output Linear 32->16 + Sigmoid.
    sizes = [latent_dim] + hidden_sizes + [output_size]
    params = [make_linear_params(keys[i], sizes[i], sizes[i + 1])
              for i in range(len(sizes) - 1)]

    z = jax.random.normal(keys[-1], (batch, latent_dim), jnp.float32)

    recon = decoder_forward(z, params)
    jax.block_until_ready(recon)

    # Plain-JAX reference of the same math.
    def ref_forward(zz):
        h = zz
        for (w, b) in params[:-1]:
            h = jnp.maximum(h @ w + b, 0.0)
        w, b = params[-1]
        return jax.nn.sigmoid(h @ w + b)

    r_ref = ref_forward(z)
    assert recon.shape == (batch, output_size)
    # approx reciprocal in the sigmoid -> allow a small tolerance
    err = float(jnp.max(jnp.abs(recon - r_ref)))
    assert jnp.allclose(recon, r_ref, atol=2e-3), err

    print("KERNEL_OK")
</pallas_src>

<mosaic_0001>
module attributes {stable_mosaic.version = 11 : i64} {
  func.func @kernel(%arg0: i32, %arg1: memref<8x128xf32, #tpu.memory_space<vmem>>, %arg2: memref<128x128xf32, #tpu.memory_space<vmem>>, %arg3: memref<1x128xf32, #tpu.memory_space<vmem>>, %arg4: memref<128x128xf32, #tpu.memory_space<vmem>>, %arg5: memref<1x128xf32, #tpu.memory_space<vmem>>, %arg6: memref<128x128xf32, #tpu.memory_space<vmem>>, %arg7: memref<1x128xf32, #tpu.memory_space<vmem>>, %arg8: memref<8x128xf32, #tpu.memory_space<vmem>>) attributes {dimension_semantics = [#tpu.dimension_semantics<parallel>], iteration_bounds = array<i64: 1>, scalar_prefetch = 0 : i64, scratch_operands = 0 : i64, tpu.core_type = #tpu.core_type<tc>, window_params = [{transform_indices = @transform_0, window_bounds = array<i64: 8, 128>}, {pipeline_mode = #tpu.pipeline_mode<synchronous>, transform_indices = @transform_1, window_bounds = array<i64: 128, 128>}, {pipeline_mode = #tpu.pipeline_mode<synchronous>, transform_indices = @transform_2, window_bounds = array<i64: 1, 128>}, {pipeline_mode = #tpu.pipeline_mode<synchronous>, transform_indices = @transform_3, window_bounds = array<i64: 128, 128>}, {pipeline_mode = #tpu.pipeline_mode<synchronous>, transform_indices = @transform_4, window_bounds = array<i64: 1, 128>}, {pipeline_mode = #tpu.pipeline_mode<synchronous>, transform_indices = @transform_5, window_bounds = array<i64: 128, 128>}, {pipeline_mode = #tpu.pipeline_mode<synchronous>, transform_indices = @transform_6, window_bounds = array<i64: 1, 128>}, {transform_indices = @transform_7, window_bounds = array<i64: 8, 128>}]} {
    %c0 = arith.constant 0 : index
    %c0_0 = arith.constant 0 : index
    %0 = vector.load %arg1[%c0, %c0_0] : memref<8x128xf32, #tpu.memory_space<vmem>>, vector<8x128xf32>
    %c0_1 = arith.constant 0 : index
    %c0_2 = arith.constant 0 : index
    %1 = vector.load %arg2[%c0_1, %c0_2] : memref<128x128xf32, #tpu.memory_space<vmem>>, vector<128x128xf32>
    %c0_3 = arith.constant 0 : index
    %c0_4 = arith.constant 0 : index
    %2 = vector.load %arg3[%c0_3, %c0_4] : memref<1x128xf32, #tpu.memory_space<vmem>>, vector<1x128xf32>
    %cst = arith.constant dense<0.000000e+00> : vector<8x128xf32>
    %3 = tpu.matmul %0, %1, %cst {dimension_numbers = #tpu.dot_dimension_numbers<[1], [0], [0], [1], [0, 0, 1, 1], [], []>} : vector<8x128xf32>, vector<128x128xf32>, vector<8x128xf32> -> vector<8x128xf32>
    %4 = vector.broadcast %2 : vector<1x128xf32> to vector<8x128xf32>
    %5 = arith.addf %3, %4 : vector<8x128xf32>
    %cst_5 = arith.constant 0.000000e+00 : f32
    %6 = vector.broadcast %cst_5 : f32 to vector<8x128xf32>
    %7 = arith.maximumf %5, %6 : vector<8x128xf32>
    %c0_6 = arith.constant 0 : index
    %c0_7 = arith.constant 0 : index
    %8 = vector.load %arg4[%c0_6, %c0_7] : memref<128x128xf32, #tpu.memory_space<vmem>>, vector<128x128xf32>
    %c0_8 = arith.constant 0 : index
    %c0_9 = arith.constant 0 : index
    %9 = vector.load %arg5[%c0_8, %c0_9] : memref<1x128xf32, #tpu.memory_space<vmem>>, vector<1x128xf32>
    %cst_10 = arith.constant dense<0.000000e+00> : vector<8x128xf32>
    %10 = tpu.matmul %7, %8, %cst_10 {dimension_numbers = #tpu.dot_dimension_numbers<[1], [0], [0], [1], [0, 0, 1, 1], [], []>} : vector<8x128xf32>, vector<128x128xf32>, vector<8x128xf32> -> vector<8x128xf32>
    %11 = vector.broadcast %9 : vector<1x128xf32> to vector<8x128xf32>
    %12 = arith.addf %10, %11 : vector<8x128xf32>
    %cst_11 = arith.constant 0.000000e+00 : f32
    %13 = vector.broadcast %cst_11 : f32 to vector<8x128xf32>
    %14 = arith.maximumf %12, %13 : vector<8x128xf32>
    %c0_12 = arith.constant 0 : index
    %c0_13 = arith.constant 0 : index
    %15 = vector.load %arg6[%c0_12, %c0_13] : memref<128x128xf32, #tpu.memory_space<vmem>>, vector<128x128xf32>
    %c0_14 = arith.constant 0 : index
    %c0_15 = arith.constant 0 : index
    %16 = vector.load %arg7[%c0_14, %c0_15] : memref<1x128xf32, #tpu.memory_space<vmem>>, vector<1x128xf32>
    %cst_16 = arith.constant dense<0.000000e+00> : vector<8x128xf32>
    %17 = tpu.matmul %14, %15, %cst_16 {dimension_numbers = #tpu.dot_dimension_numbers<[1], [0], [0], [1], [0, 0, 1, 1], [], []>} : vector<8x128xf32>, vector<128x128xf32>, vector<8x128xf32> -> vector<8x128xf32>
    %18 = vector.broadcast %16 : vector<1x128xf32> to vector<8x128xf32>
    %19 = arith.addf %17, %18 : vector<8x128xf32>
    %cst_17 = arith.constant 0.000000e+00 : f32
    %20 = vector.broadcast %cst_17 : f32 to vector<8x128xf32>
    %21 = arith.subf %20, %19 : vector<8x128xf32>
    %22 = math.exp %21 : vector<8x128xf32>
    %cst_18 = arith.constant 1.000000e+00 : f32
    %23 = vector.broadcast %cst_18 : f32 to vector<8x128xf32>
    %24 = arith.addf %23, %22 : vector<8x128xf32>
    %25 = tpu.reciprocal %24 {approx = true} : vector<8x128xf32> -> vector<8x128xf32>
    %c0_19 = arith.constant 0 : index
    %c0_20 = arith.constant 0 : index
    %26 = vector.load %arg8[%c0_19, %c0_20] : memref<8x128xf32, #tpu.memory_space<vmem>>, vector<8x128xf32>
    tpu.vector_store %arg8[%c0_19, %c0_20], %25 {strides = array<i32>} : memref<8x128xf32, #tpu.memory_space<vmem>>, vector<8x128xf32>,
    return
  }
  func.func @transform_0(%arg0: i32) -> (i32, i32) {
    %c0_i32 = arith.constant 0 : i32
    %c0_i32_0 = arith.constant 0 : i32
    return %arg0, %c0_i32 : i32, i32
  }
  func.func @transform_1(%arg0: i32) -> (i32, i32) {
    %c0_i32 = arith.constant 0 : i32
    %c0_i32_0 = arith.constant 0 : i32
    %c0_i32_1 = arith.constant 0 : i32
    return %c0_i32, %c0_i32_0 : i32, i32
  }
  func.func @transform_2(%arg0: i32) -> (i32, i32) {
    %c0_i32 = arith.constant 0 : i32
    %c0_i32_0 = arith.constant 0 : i32
    %c0_i32_1 = arith.constant 0 : i32
    return %c0_i32, %c0_i32_0 : i32, i32
  }
  func.func @transform_3(%arg0: i32) -> (i32, i32) {
    %c0_i32 = arith.constant 0 : i32
    %c0_i32_0 = arith.constant 0 : i32
    %c0_i32_1 = arith.constant 0 : i32
    return %c0_i32, %c0_i32_0 : i32, i32
  }
  func.func @transform_4(%arg0: i32) -> (i32, i32) {
    %c0_i32 = arith.constant 0 : i32
    %c0_i32_0 = arith.constant 0 : i32
    %c0_i32_1 = arith.constant 0 : i32
    return %c0_i32, %c0_i32_0 : i32, i32
  }
  func.func @transform_5(%arg0: i32) -> (i32, i32) {
    %c0_i32 = arith.constant 0 : i32
    %c0_i32_0 = arith.constant 0 : i32
    %c0_i32_1 = arith.constant 0 : i32
    return %c0_i32, %c0_i32_0 : i32, i32
  }
  func.func @transform_6(%arg0: i32) -> (i32, i32) {
    %c0_i32 = arith.constant 0 : i32
    %c0_i32_0 = arith.constant 0 : i32
    %c0_i32_1 = arith.constant 0 : i32
    return %c0_i32, %c0_i32_0 : i32, i32
  }
  func.func @transform_7(%arg0: i32) -> (i32, i32) {
    %c0_i32 = arith.constant 0 : i32
    %c0_i32_0 = arith.constant 0 : i32
    return %arg0, %c0_i32 : i32, i32
  }
}

</mosaic_0001>

<bundles_post_ra>
// kernel: tpu_custom_call.1
= control target key start
LH: loop header
LB: loop body
LE: loop exit
PB: predicated region body
PF: predicated region fallthrough
CT: control target
= control target key end

     0   :  { %12 = vsyncpa [#allocation3], 0  ;;  %s906_s0 = inlined_call_operand.hbm [shape: f32[8,128], index: 0, kind: input, shape index: {}]   ;;  %s907_s1 = inlined_call_operand.hbm [shape: f32[128,128], index: 1, kind: input, shape index: {}]   ;;  %s908_s2 = inlined_call_operand.vmem [shape: f32[1,128], index: 2, kind: input, shape index: {}]   ;;  %s909_s3 = inlined_call_operand.hbm [shape: f32[128,128], index: 3, kind: input, shape index: {}]   ;;  %s910_s4 = inlined_call_operand.vmem [shape: f32[1,128], index: 4, kind: input, shape index: {}]   ;;  %s911_s5 = inlined_call_operand.hbm [shape: f32[128,128], index: 5, kind: input, shape index: {}]   ;;  %s912_s6 = inlined_call_operand.vmem [shape: f32[1,128], index: 6, kind: input, shape index: {}]   ;;  %s913_s7 = inlined_call_operand.hbm [shape: f32[8,128], index: 7, kind: output, shape index: {}]  }
   0x1   :  { %13 = vsyncpa [#allocation6], 0 }
   0x2   :  { %14 = vsyncpa [#allocation9], 0 }
   0x3   :  { %15 = vsyncpa [#allocation4], 0  ;;  %s748_s24 = smov [#allocation5]   ;;  %s630_s28 = scalar_lea.hbm %s907_s1, 2048 }
   0x4   :  { %s31_s25 = sshll.u32 %s748_s24, 4  ;;  %p631_p0 = scmp.ne.s32.totalorder %s907_s1, %s630_s28  ;;  %s32_s25 = int_to_ptr.vmem [resolvable:$true] %s31_s25 }
   0x5   :  { %p634_p1 = scmp.lt.u32.totalorder %s630_s28, %s907_s1 }
   0x7   :  { %p636_p2 = pnand %p634_p1, %p631_p0 }
   0x9   :  { %639 = shalt.err (!%p636_p2)
}
   0xa   :  { %s640_s10 = scalar_lea.vmem %s32_s25, 2048  ;;  %p645_p4 = scmp.lt.s32.totalorder %s32_s25, %s32_s25 }
   0xb   :  { %p641_p3 = scmp.ne.s32.totalorder %s32_s25, %s640_s10  ;;  %p646_p5 = scmp.lt.s32.totalorder %s640_s10, %s640_s10 }
   0xd   :  { %p647_p6 = por %p646_p5, %p645_p4 }
   0xf   :  { %p648_p7 = pnand %p647_p6, %p641_p3 }
  0x11   :  { %651 = shalt.err (!%p648_p7)
}
  0x12   :  { %s749_s11 = smov 128   ;;  %s750_s12 = smov 8  }
  0x13   :  { %37 = dma.hbm_to_vmem [thread:$0]  %s907_s1, 2048, %s32_s25, [#allocation6], %s749_s11, %s749_s11, %s750_s12  }
  0x14   :  { %s751_s15 = smov [#allocation2]   ;;  %s752_s17 = smov [#allocation7]  }
  0x15   :  { %s22_s16 = sshll.u32 %s751_s15, 4  ;;  %s45_s18 = sshll.u32 %s752_s17, 4  ;;  %s23_s16 = int_to_ptr.vmem [resolvable:$true] %s22_s16  ;;  %s46_s18 = int_to_ptr.vmem [resolvable:$true] %s45_s18 }
  0x16   :  { %s652_s21 = scalar_lea.hbm %s906_s0, 128 }
  0x17   :  { %p653_p8 = scmp.ne.s32.totalorder %s906_s0, %s652_s21  ;;  %p656_p9 = scmp.lt.u32.totalorder %s652_s21, %s906_s0 }
  0x19   :  { %p658_p10 = pnand %p656_p9, %p653_p8 }
  0x1b   :  { %661 = shalt.err (!%p658_p10)
}
  0x1c   :  { %s662_s1 = scalar_lea.vmem %s23_s16, 128  ;;  %p667_p12 = scmp.lt.s32.totalorder %s23_s16, %s23_s16 }
  0x1d   :  { %p663_p11 = scmp.ne.s32.totalorder %s23_s16, %s662_s1  ;;  %p668_p13 = scmp.lt.s32.totalorder %s662_s1, %s662_s1 }
  0x1f   :  { %p669_p0 = por %p668_p13, %p667_p12 }
  0x21   :  { %p670_p1 = pnand %p669_p0, %p663_p11 }
  0x23   :  { %673 = shalt.err (!%p670_p1)
}
  0x24   :  { %25 = dma.hbm_to_vmem [thread:$0]  %s906_s0, 128, %s23_s16, [#allocation3]  }
  0x25   :  { %s674_s30 = scalar_lea.hbm %s909_s3, 2048 }
  0x26   :  { %p675_p2 = scmp.ne.s32.totalorder %s909_s3, %s674_s30  ;;  %p678_p3 = scmp.lt.u32.totalorder %s674_s30, %s909_s3 }
  0x28   :  { %p680_p4 = pnand %p678_p3, %p675_p2 }
  0x2a   :  { %683 = shalt.err (!%p680_p4)
}
  0x2b   :  { %s684_s14 = scalar_lea.vmem %s46_s18, 2048  ;;  %p689_p6 = scmp.lt.s32.totalorder %s46_s18, %s46_s18 }
  0x2c   :  { %p685_p5 = scmp.ne.s32.totalorder %s46_s18, %s684_s14  ;;  %p690_p7 = scmp.lt.s32.totalorder %s684_s14, %s684_s14 }
  0x2e   :  { %p691_p8 = por %p690_p7, %p689_p6 }
  0x30   :  { %p692_p9 = pnand %p691_p8, %p685_p5 }
  0x32   :  { %695 = shalt.err (!%p692_p9)
}
  0x33   :  { %51 = dma.hbm_to_vmem [thread:$0]  %s909_s3, 2048, %s46_s18, [#allocation6], %s749_s11, %s749_s11, %s750_s12  }
  0x34   :  { %s753_s16 = smov [#allocation8]   ;;  %s696_s21 = scalar_lea.hbm %s911_s5, 2048 }
  0x35   :  { %s59_s17 = sshll.u32 %s753_s16, 4  ;;  %p697_p10 = scmp.ne.s32.totalorder %s911_s5, %s696_s21  ;;  %s60_s17 = int_to_ptr.vmem [resolvable:$true] %s59_s17 }
  0x36   :  { %p700_p11 = scmp.lt.u32.totalorder %s696_s21, %s911_s5 }
  0x38   :  { %p702_p12 = pnand %p700_p11, %p697_p10 }
  0x3a   :  { %705 = shalt.err (!%p702_p12)
}
  0x3b   :  { %s706_s1 = scalar_lea.vmem %s60_s17, 2048  ;;  %p711_p0 = scmp.lt.s32.totalorder %s60_s17, %s60_s17 }
  0x3c   :  { %p707_p13 = scmp.ne.s32.totalorder %s60_s17, %s706_s1  ;;  %p712_p1 = scmp.lt.s32.totalorder %s706_s1, %s706_s1 }
  0x3e   :  { %p713_p2 = por %p712_p1, %p711_p0 }
  0x40   :  { %p714_p3 = pnand %p713_p2, %p707_p13 }
  0x42   :  { %717 = shalt.err (!%p714_p3)
}
  0x43   :  { %65 = dma.hbm_to_vmem [thread:$0]  %s911_s5, 2048, %s60_s17, [#allocation9], %s749_s11, %s749_s11, %s750_s12  }
  0x44   :  { %740 = dma.done.wait [#allocation3], 128  }
  0x45   :  { %741 = vsyncadd [#allocation3], 4294967168 }
  0x46   :  { %742 = dma.done.wait [#allocation6], 4096  }
  0x47   :  { %743 = vsyncadd [#allocation6], 4294963200 }
  0x48   :  { %744 = dma.done.wait [#allocation9], 2048  }
  0x49   :  { %745 = vsyncadd [#allocation9], 4294965248  ;;  %v754_v0 = vmov 0.0|0.0   ;;  %vm755_vm0 = vmmov 0   ;;  %v756_v1 = vmov 0.0   ;;  %v81_v2 = vld [vmem:[#allocation5] sm:$0xff] }
  0x4a   :  { %544 = vmatprep.subr.bf16.mxu0 %v754_v0  ;;  %471 = vmatprep.mubr.msk.f32.mxu0 %vm755_vm0, %v756_v1  ;;  %v82_v3 = vld [vmem:[#allocation5 + $0x8] sm:$0xff]  ;;  %v83_v4 = vld [vmem:[#allocation5 + $0x10] sm:$0xff]  ;;  %v84_v6 = vld [vmem:[#allocation5 + $0x18] sm:$0xff]  ;;  %s757_s28 = smov [#allocation10]  }
  0x4b   :  { %568 = vmatprep.subr.bf16.mxu1 %v754_v0  ;;  %506 = vmatprep.mubr.msk.f32.mxu1 %vm755_vm0, %v756_v1  ;;  %v545_v5 = vpack.c.bf16 %v82_v3, %v81_v2  ;;  %v548_v7 = vpack.c.bf16 %v84_v6, %v83_v4  ;;  %v85_v8 = vld [vmem:[#allocation5 + $0x20] sm:$0xff]  ;;  %v86_v9 = vld [vmem:[#allocation5 + $0x28] sm:$0xff]  ;;  %v177_v12 = vld [vmem:[#allocation7 + $0x10] sm:$0xff] }
  0x4c   :  { %v175_v10 = vld [vmem:[#allocation7] sm:$0xff]  ;;  %v176_v11 = vld [vmem:[#allocation7 + $0x8] sm:$0xff]  ;;  %v178_v13 = vld [vmem:[#allocation7 + $0x18] sm:$0xff]  ;;  %v551_v14 = vpack.c.bf16 %v86_v9, %v85_v8 }
  0x4d   :  { %546 = vmatpush3.bf16.msra.mxu0 %v545_v5  ;;  %v569_v15 = vpack.c.bf16 %v176_v11, %v175_v10  ;;  %v87_v16 = vld [vmem:[#allocation5 + $0x30] sm:$0xff]  ;;  %v88_v17 = vld [vmem:[#allocation5 + $0x38] sm:$0xff]  ;;  %v572_v18 = vpack.c.bf16 %v178_v13, %v177_v12  ;;  %v179_v19 = vld [vmem:[#allocation7 + $0x20] sm:$0xff] }
  0x4e   :  { %547 = vmatprep.subr.bf16.mxu0 %v754_v0  ;;  %v180_v20 = vld [vmem:[#allocation7 + $0x28] sm:$0xff]  ;;  %v554_v21 = vpack.c.bf16 %v88_v17, %v87_v16  ;;  %v89_v22 = vld [vmem:[#allocation5 + $0x40] sm:$0xff]  ;;  %v181_v25 = vld [vmem:[#allocation7 + $0x30] sm:$0xff] }
  0x4f   :  { %570 = vmatpush3.bf16.msra.mxu1 %v569_v15  ;;  %v90_v23 = vld [vmem:[#allocation5 + $0x48] sm:$0xff]  ;;  %v575_v24 = vpack.c.bf16 %v180_v20, %v179_v19  ;;  %v182_v26 = vld [vmem:[#allocation7 + $0x38] sm:$0xff]  ;;  %v91_v28 = vld [vmem:[#allocation5 + $0x50] sm:$0xff] }
  0x50   :  { %571 = vmatprep.subr.bf16.mxu1 %v754_v0  ;;  %v557_v27 = vpack.c.bf16 %v90_v23, %v89_v22  ;;  %v92_v29 = vld [vmem:[#allocation5 + $0x58] sm:$0xff]  ;;  %v578_v30 = vpack.c.bf16 %v182_v26, %v181_v25  ;;  %v183_v31 = vld [vmem:[#allocation7 + $0x40] sm:$0xff]  ;;  %v184_v32 = vld [vmem:[#allocation7 + $0x48] sm:$0xff] }
  0x51   :  { %549 = vmatpush3.bf16.msra.mxu0 %v548_v7  ;;  %v560_v33 = vpack.c.bf16 %v92_v29, %v91_v28  ;;  %v93_v34 = vld [vmem:[#allocation5 + $0x60] sm:$0xff]  ;;  %v94_v35 = vld [vmem:[#allocation5 + $0x68] sm:$0xff]  ;;  %v581_v36 = vpack.c.bf16 %v184_v32, %v183_v31  ;;  %v185_v37 = vld [vmem:[#allocation7 + $0x50] sm:$0xff] }
  0x52   :  { %550 = vmatprep.subr.bf16.mxu0 %v754_v0  ;;  %v186_v38 = vld [vmem:[#allocation7 + $0x58] sm:$0xff]  ;;  %v563_v39 = vpack.c.bf16 %v94_v35, %v93_v34  ;;  %v95_v40 = vld [vmem:[#allocation5 + $0x70] sm:$0xff]  ;;  %v187_v43 = vld [vmem:[#allocation7 + $0x60] sm:$0xff] }
  0x53   :  { %573 = vmatpush3.bf16.msra.mxu1 %v572_v18  ;;  %v96_v41 = vld [vmem:[#allocation5 + $0x78] sm:$0xff]  ;;  %v584_v42 = vpack.c.bf16 %v186_v38, %v185_v37  ;;  %v188_v44 = vld [vmem:[#allocation7 + $0x68] sm:$0xff]  ;;  %v189_v48 = vld [vmem:[#allocation7 + $0x70] sm:$0xff] }
  0x54   :  { %574 = vmatprep.subr.bf16.mxu1 %v754_v0  ;;  %v566_v45 = vpack.c.bf16 %v96_v41, %v95_v40  ;;  %v587_v46 = vpack.c.bf16 %v188_v44, %v187_v43  ;;  %v80_v47 = vld [vmem:[#allocation2] sm:$0xff]  ;;  %v269_v51 = vld [vmem:[#allocation8] sm:$0xff]  ;;  %v270_v52 = vld [vmem:[#allocation8 + $0x8] sm:$0xff] }
  0x55   :  { %552 = vmatpush3.bf16.msra.mxu0 %v551_v14  ;;  %v190_v49 = vld [vmem:[#allocation7 + $0x78] sm:$0xff]  ;;  %v271_v53 = vld [vmem:[#allocation8 + $0x10] sm:$0xff]  ;;  %v593_v54 = vpack.c.bf16 %v270_v52, %v269_v51  ;;  %v273_v57 = vld [vmem:[#allocation8 + $0x20] sm:$0xff] }
  0x56   :  { %553 = vmatprep.subr.bf16.mxu0 %v754_v0  ;;  %v590_v50 = vpack.c.bf16 %v190_v49, %v189_v48  ;;  %v272_v55 = vld [vmem:[#allocation8 + $0x18] sm:$0xff]  ;;  %v274_v58 = vld [vmem:[#allocation8 + $0x28] sm:$0xff]  ;;  %v275_v60 = vld [vmem:[#allocation8 + $0x30] sm:$0xff] }
  0x57   :  { %576 = vmatpush3.bf16.msra.mxu1 %v575_v24  ;;  %v596_v56 = vpack.c.bf16 %v272_v55, %v271_v53  ;;  %v599_v59 = vpack.c.bf16 %v274_v58, %v273_v57  ;;  %v276_v61 = vld [vmem:[#allocation8 + $0x38] sm:$0xff]  ;;  %v277_v63 = vld [vmem:[#allocation8 + $0x40] sm:$0xff]  ;;  %v279_v3 = vld [vmem:[#allocation8 + $0x50] sm:$0xff] }
  0x58   :  { %577 = vmatprep.subr.bf16.mxu1 %v754_v0  ;;  %v602_v62 = vpack.c.bf16 %v276_v61, %v275_v60  ;;  %v280_v4 = vld [vmem:[#allocation8 + $0x58] sm:$0xff]  ;;  %v281_v6 = vld [vmem:[#allocation8 + $0x60] sm:$0xff]  ;;  %v282_v7 = vld [vmem:[#allocation8 + $0x68] sm:$0xff] }
  0x59   :  { %555 = vmatpush3.bf16.msra.mxu0 %v554_v21  ;;  %v608_v5 = vpack.c.bf16 %v280_v4, %v279_v3  ;;  %v611_v8 = vpack.c.bf16 %v282_v7, %v281_v6  ;;  %v385_v9 = vld [vmem:[%s908_s2] ss:$0 sm:$0xff]  ;;  %v283_v14 = vld [vmem:[#allocation8 + $0x70] sm:$0xff] }
  0x5a   :  { %556 = vmatprep.subr.bf16.mxu0 %v754_v0  ;;  %v284_v15 = vld [vmem:[#allocation8 + $0x78] sm:$0xff] }
  0x5b   :  { %579 = vmatpush3.bf16.msra.mxu1 %v578_v30  ;;  %v614_v16 = vpack.c.bf16 %v284_v15, %v283_v14  ;;  %v386_v17 = vld [vmem:[%s910_s4] ss:$0 sm:$0xff]  ;;  %s374_s4 = sshll.u32 %s757_s28, 4  ;;  %s375_s4 = int_to_ptr.vmem [resolvable:$true] %s374_s4 }
  0x5c   :  { %580 = vmatprep.subr.bf16.mxu1 %v754_v0  ;;  %v387_v21 = vld [vmem:[%s912_s6] ss:$0 sm:$0xff]  ;;  %s718_s29 = scalar_lea.vmem %s375_s4, 128  ;;  %p723_p5 = scmp.lt.s32.totalorder %s375_s4, %s375_s4 }
  0x5d   :  { %558 = vmatpush3.bf16.msra.mxu0 %v557_v27  ;;  %p719_p4 = scmp.ne.s32.totalorder %s375_s4, %s718_s29  ;;  %p724_p6 = scmp.lt.s32.totalorder %s718_s29, %s718_s29 }
  0x5e   :  { %559 = vmatprep.subr.bf16.mxu0 %v754_v0 }
  0x5f   :  { %582 = vmatpush3.bf16.msra.mxu1 %v581_v36  ;;  %p725_p7 = por %p724_p6, %p723_p5 }
  0x60   :  { %583 = vmatprep.subr.bf16.mxu1 %v754_v0 }
  0x61   :  { %561 = vmatpush3.bf16.msra.mxu0 %v560_v33  ;;  %p726_p8 = pnand %p725_p7, %p719_p4 }
  0x62   :  { %562 = vmatprep.subr.bf16.mxu0 %v754_v0 }
  0x63   :  { %585 = vmatpush3.bf16.msra.mxu1 %v584_v42 }
  0x64   :  { %586 = vmatprep.subr.bf16.mxu1 %v754_v0 }
  0x65   :  { %564 = vmatpush3.bf16.msra.mxu0 %v563_v39 }
  0x66   :  { %565 = vmatprep.subr.bf16.mxu0 %v754_v0 }
  0x67   :  { %588 = vmatpush3.bf16.msra.mxu1 %v587_v46 }
  0x68   :  { %589 = vmatprep.subr.bf16.mxu1 %v754_v0 }
  0x69   :  { %567 = vmatpush3.bf16.msra.mxu0 %v566_v45 }
  0x6a   :  { %592 = vmatprep.subr.bf16.mxu0 %v754_v0 }
  0x6b   :  { %591 = vmatpush3.bf16.msra.mxu1 %v590_v50 }
  0x6c   :  { %472 = vmatmul.mubr.f32.vlgmr.msra.gmra.mrb[0].mxu0 %v80_v47 }
  0x6d   :  { %541 = vmatprep.mubr.msk.f32.mxu0 %vm755_vm0, %v756_v1  ;;  %594 = vmatpush3.bf16.msra.mxu0 %v593_v54  ;;  %v278_v1 = vld [vmem:[#allocation8 + $0x48] sm:$0xff] }
  0x6e   :  { %595 = vmatprep.subr.bf16.mxu0 %v754_v0  ;;  %v605_v2 = vpack.c.bf16 %v278_v1, %v277_v63 }
  0x71   :  { %597 = vmatpush3.bf16.msra.mxu0 %v596_v56 }
  0x72   :  { %598 = vmatprep.subr.bf16.mxu0 %v754_v0 }
  0x75   :  { %600 = vmatpush3.bf16.msra.mxu0 %v599_v59 }
  0x76   :  { %601 = vmatprep.subr.bf16.mxu0 %v754_v0 }
  0x79   :  { %603 = vmatpush3.bf16.msra.mxu0 %v602_v62 }
  0x7a   :  { %604 = vmatprep.subr.bf16.mxu0 %v754_v0 }
  0x7d   :  { %606 = vmatpush3.bf16.msra.mxu0 %v605_v2 }
  0x7e   :  { %607 = vmatprep.subr.bf16.mxu0 %v754_v0 }
  0x81   :  { %609 = vmatpush3.bf16.msra.mxu0 %v608_v5 }
  0x82   :  { %610 = vmatprep.subr.bf16.mxu0 %v754_v0 }
  0x85   :  { %612 = vmatpush3.bf16.msra.mxu0 %v611_v8 }
  0x86   :  { %613 = vmatprep.subr.bf16.mxu0 %v754_v0 }
  0x89   :  { %615 = vmatpush3.bf16.msra.mxu0 %v614_v16 }
 0x13f   :  { %v170_v10 = vpop.f32.mrb[0].mxu0 }
 0x140   :  { %v171_v11 = vadd.f32 %v385_v9, %v170_v10  ;;  %v473_v12 = vpop.f32.mrb[1].mxu0 }
 0x142   :  { %v174_v13 = vmax.f32 %v171_v11, 0.0 }
 0x144   :  { %507 = vmatmul.mubr.f32.vlgmr.msra.gmra.mrb[0].mxu1 %v174_v13 }
 0x217   :  { %v264_v18 = vpop.f32.mrb[0].mxu1 }
 0x218   :  { %v265_v19 = vadd.f32 %v386_v17, %v264_v18  ;;  %v508_v0 = vpop.f32.mrb[1].mxu1 }
 0x21a   :  { %v268_v20 = vmax.f32 %v265_v19, 0.0 }
 0x21c   :  { %542 = vmatmul.mubr.f32.vlgmr.msra.gmra.mrb[2].mxu0 %v268_v20 }
 0x2ef   :  { %v358_v22 = vpop.f32.mrb[2].mxu0 }
 0x2f0   :  { %v359_v23 = vadd.f32 %v387_v21, %v358_v22  ;;  %v543_v24 = vpop.f32.mrb[3].mxu0 }
 0x2f2   :  { %v362_v25 = vsub.f32 0.0, %v359_v23 }
 0x2f4   :  { %v363_v26 = vmul.f32 1.442695, %v362_v25 }
 0x2f6   :  { %626 = vpow2.f32 %v363_v26 }
 0x300   :  { %v627_v27 = vpop.eup %626 }
 0x301   :  { %v365_v28 = vadd.f32 1.0, %v627_v27 }
 0x303   :  { %628 = vrcp.f32 %v365_v28 }
 0x30d   :  { %v629_v29 = vpop.eup %628 }
 0x30e   :  { %367 = vst [vmem:[#allocation10] sm:$0xff] %v629_v29 }
 0x30f   :  { %729 = shalt.err (!%p726_p8)
}
 0x310   :  { %s730_s8 = scalar_lea.hbm %s913_s7, 128 }
 0x311   :  { %p731_p9 = scmp.ne.s32.totalorder %s913_s7, %s730_s8  ;;  %p734_p10 = scmp.lt.u32.totalorder %s730_s8, %s913_s7 }
 0x313   :  { %p736_p11 = pnand %p734_p10, %p731_p9 }
 0x315   :  { %739 = shalt.err (!%p736_p11)
}
 0x316   :  { %377 = dma.vmem_to_hbm [thread:$0]  %s375_s4, 128, %s913_s7, [#allocation4]  }
 0x317   :  { %746 = dma.done.wait [#allocation4], 128  }
 0x318   :  { %747 = vsyncadd [#allocation4], 4294967168 }
 0x319   :  { %381 = vsyncpa [#allocation3], 1 }
 0x31a   :  { %382 = vsyncpa [#allocation6], 1 }
 0x31b   :  { %383 = vsyncpa [#allocation9], 1 }
 0x31c   :  { %384 = vsyncpa [#allocation4], 1 }

</bundles_post_ra>
